<compile_context>
chip_gen: v5e
topology: v5e:2x2
jax: 0.10.0
libtpu: 0.0.40
codegen_flags: <defaults>
</compile_context>

<pallas_src>
import functools
import math

import jax
import jax.numpy as jnp
from jax.experimental import pallas as pl
from jax.experimental.pallas import tpu as pltpu


def _semantic_decoder_kernel(x_ref, wqkv_ref, wfc_ref, bfc_ref, out_ref,
                             *, batch, seq, feat, compute_dtype, approx_recip):
    D = feat
    x = x_ref[...]                        # (B*S, D)  compute_dtype
    w_qkv = wqkv_ref[...]                 # (6D, D)   compute_dtype (PyTorch (out,in) layout)

    # Fused projection for both branches over all B*S rows at once.
    # Contract the "in" axis of the weight (== x @ W.T) -> no transpose.
    qkv = jax.lax.dot_general(
        x, w_qkv, (((1,), (1,)), ((), ())),
        preferred_element_type=jnp.float32)            # (B*S, 6D) float32

    scale = 1.0 / math.sqrt(D)

    def attention(q, k, v):
        # q, k, v: (S, D) float32.  scores = q @ k^T without materializing k.T
        s = jax.lax.dot_general(
            q.astype(compute_dtype), k.astype(compute_dtype),
            (((1,), (1,)), ((), ())),
            preferred_element_type=jnp.float32) * scale            # (S, S)
        # Numerically-stable softmax, kept in float32 (VPU/EUP path).
        s = s - jnp.max(s, axis=-1, keepdims=True)
        p = jnp.exp(s)
        denom = jnp.sum(p, axis=-1, keepdims=True)
        if approx_recip:
            p = p * pl.reciprocal(denom, approx=True)              # EUP vrcp
        else:
            p = p / denom
        return jnp.dot(p.astype(compute_dtype), v.astype(compute_dtype),
                       preferred_element_type=jnp.float32)         # (S, D)

    # Only the (S, S) attention is inherently per-batch; batch is small so
    # unroll it statically and keep everything 2D for the MXU.
    per_batch = []
    for b in range(batch):
        blk = qkv[b * seq:(b + 1) * seq]                           # (S, 6D)
        o_view = attention(blk[:, 0 * D:1 * D],
                           blk[:, 1 * D:2 * D],
                           blk[:, 2 * D:3 * D])
        o_content = attention(blk[:, 3 * D:4 * D],
                              blk[:, 4 * D:5 * D],
                              blk[:, 5 * D:6 * D])
        per_batch.append(o_view * 0.3 + o_content * 0.7)           # (S, D) f32

    o_combined = jnp.concatenate(per_batch, axis=0)                # (B*S, D) f32

    # Final classifier over all B*S rows at once.  Output lanes are padded to
    # a multiple of 128 in the wrapper -> unmasked, lane-dense stores.
    logits = jax.lax.dot_general(
        o_combined.astype(compute_dtype), wfc_ref[...],
        (((1,), (1,)), ((), ())),
        preferred_element_type=jnp.float32) + bfc_ref[...]         # (B*S, Cpad)
    out_ref[...] = logits


def prepare_weights(params, *, fast=False):
    """One-time weight prep (hoisted out of the per-call path): fuse the six
    projection matrices, pad the classifier to 128 output lanes, cast to the
    matmul compute dtype.  Weights keep PyTorch (out, in) layout."""
    compute_dtype = jnp.bfloat16 if fast else jnp.float32
    C, D = params["fc_w"].shape
    C_pad = max(128, ((C + 127) // 128) * 128)

    w_qkv = jnp.concatenate(
        [params["wq_view"], params["wk_view"], params["wv_view"],
         params["wq_content"], params["wk_content"], params["wv_content"]],
        axis=0).astype(compute_dtype)                              # (6D, D)

    w_fc = jnp.zeros((C_pad, D), compute_dtype).at[:C, :].set(
        params["fc_w"].astype(compute_dtype))                      # (Cpad, D)
    b_fc = jnp.zeros((1, C_pad), jnp.float32).at[0, :C].set(
        params["fc_b"].astype(jnp.float32))                        # (1, Cpad)

    return dict(w_qkv=w_qkv, w_fc=w_fc, b_fc=b_fc, num_classes=C,
                compute_dtype=compute_dtype, fast=fast)


def semantic_decoder_apply(x, prep):
    """x: (B, S, D) float32.  Returns logits (B, S, num_classes) float32."""
    B, S, D = x.shape
    C = prep["num_classes"]
    compute_dtype = prep["compute_dtype"]
    C_pad = prep["w_fc"].shape[0]

    x2d = x.reshape(B * S, D).astype(compute_dtype)

    kernel = functools.partial(
        _semantic_decoder_kernel, batch=B, seq=S, feat=D,
        compute_dtype=compute_dtype, approx_recip=prep["fast"])

    out = pl.pallas_call(
        kernel,
        out_shape=jax.ShapeDtypeStruct((B * S, C_pad), jnp.float32),
        grid=(1,),                                 # whole problem in one step
        in_specs=[
            pl.BlockSpec((B * S, D), lambda i: (0, 0)),
            pl.BlockSpec((6 * D, D), lambda i: (0, 0)),
            pl.BlockSpec((C_pad, D), lambda i: (0, 0)),
            pl.BlockSpec((1, C_pad), lambda i: (0, 0)),
        ],
        out_specs=pl.BlockSpec((B * S, C_pad), lambda i: (0, 0)),
        compiler_params=pltpu.CompilerParams(
            dimension_semantics=("arbitrary",)),
    )(x2d, prep["w_qkv"], prep["w_fc"], prep["b_fc"])

    return out[:, :C].reshape(B, S, C)


def semantic_decoder_forward(x, params, *, fast=False):
    """Convenience wrapper: prep + apply in one call."""
    return semantic_decoder_apply(x, prepare_weights(params, fast=fast))


def _init_params(key, feature_dim, num_classes):
    ks = jax.random.split(key, 8)
    scale = 1.0 / jnp.sqrt(jnp.float32(feature_dim))
    mk = lambda k, shape: (jax.random.uniform(k, shape, jnp.float32,
                                              minval=-1.0, maxval=1.0) * scale)
    return {
        "wq_view":    mk(ks[0], (feature_dim, feature_dim)),
        "wk_view":    mk(ks[1], (feature_dim, feature_dim)),
        "wv_view":    mk(ks[2], (feature_dim, feature_dim)),
        "wq_content": mk(ks[3], (feature_dim, feature_dim)),
        "wk_content": mk(ks[4], (feature_dim, feature_dim)),
        "wv_content": mk(ks[5], (feature_dim, feature_dim)),
        "fc_w":       mk(ks[6], (num_classes, feature_dim)),
        "fc_b":       mk(ks[7], (num_classes,)),
    }


def _reference_forward(x, params):
    """Pure-JAX f32 reference mirroring the PyTorch module exactly."""
    def attn(x, wq, wk, wv):
        q = x @ wq.T
        k = x @ wk.T
        v = x @ wv.T
        d_k = q.shape[-1]
        s = jnp.einsum("bqd,bkd->bqk", q, k) / jnp.sqrt(jnp.float32(d_k))
        w = jax.nn.softmax(s, axis=-1)
        return jnp.einsum("bqk,bkd->bqd", w, v)

    o_v = attn(x, params["wq_view"], params["wk_view"], params["wv_view"])
    o_c = attn(x, params["wq_content"], params["wk_content"], params["wv_content"])
    o = o_v * 0.3 + o_c * 0.7
    return o @ params["fc_w"].T + params["fc_b"]


if __name__ == "__main__":
    B, S, D, C = 2, 8, 32, 16  # batch, seq, feature_dim, num_classes

    key = jax.random.PRNGKey(0)
    k_x, k_p = jax.random.split(key)
    x = jax.random.normal(k_x, (B, S, D), dtype=jnp.float32)
    params = _init_params(k_p, D, C)

    ref = _reference_forward(x, params)

    # Exact path: f32 MXU operands, exact softmax -> matches PyTorch numerics.
    prep = prepare_weights(params, fast=False)
    logits = jax.block_until_ready(semantic_decoder_apply(x, prep))
    assert logits.shape == (B, S, C)
    assert jnp.allclose(logits, ref, atol=1e-4, rtol=1e-4), "exact-path mismatch"

    # Fast path: bf16 MXU operands (f32 accumulation) + approx softmax recip.
    prep_fast = prepare_weights(params, fast=True)
    logits_fast = jax.block_until_ready(semantic_decoder_apply(x, prep_fast))
    assert jnp.allclose(logits_fast, ref, atol=5e-2, rtol=5e-2), "fast-path mismatch"

    print("KERNEL_OK")
</pallas_src>

<mosaic_0001>
module attributes {stable_mosaic.version = 11 : i64} {
  func.func @_semantic_decoder_kernel(%arg0: i32, %arg1: memref<16x32xf32, #tpu.memory_space<vmem>>, %arg2: memref<192x32xf32, #tpu.memory_space<vmem>>, %arg3: memref<128x32xf32, #tpu.memory_space<vmem>>, %arg4: memref<1x128xf32, #tpu.memory_space<vmem>>, %arg5: memref<16x128xf32, #tpu.memory_space<vmem>>) attributes {dimension_semantics = [#tpu.dimension_semantics<arbitrary>], iteration_bounds = array<i64: 1>, scalar_prefetch = 0 : i64, scratch_operands = 0 : i64, tpu.core_type = #tpu.core_type<tc>, window_params = [{pipeline_mode = #tpu.pipeline_mode<synchronous>, transform_indices = @transform_0, window_bounds = array<i64: 16, 32>}, {pipeline_mode = #tpu.pipeline_mode<synchronous>, transform_indices = @transform_1, window_bounds = array<i64: 192, 32>}, {pipeline_mode = #tpu.pipeline_mode<synchronous>, transform_indices = @transform_2, window_bounds = array<i64: 128, 32>}, {pipeline_mode = #tpu.pipeline_mode<synchronous>, transform_indices = @transform_3, window_bounds = array<i64: 1, 128>}, {pipeline_mode = #tpu.pipeline_mode<synchronous>, transform_indices = @transform_4, window_bounds = array<i64: 16, 128>}]} {
    %c0 = arith.constant 0 : index
    %c0_0 = arith.constant 0 : index
    %0 = vector.load %arg1[%c0, %c0_0] : memref<16x32xf32, #tpu.memory_space<vmem>>, vector<16x32xf32>
    %c0_1 = arith.constant 0 : index
    %c0_2 = arith.constant 0 : index
    %1 = vector.load %arg2[%c0_1, %c0_2] : memref<192x32xf32, #tpu.memory_space<vmem>>, vector<192x32xf32>
    %cst = arith.constant dense<0.000000e+00> : vector<16x192xf32>
    %2 = tpu.matmul %0, %1, %cst {dimension_numbers = #tpu.dot_dimension_numbers<[1], [1], [0], [0], [0, 0, 1, 0], [], []>} : vector<16x32xf32>, vector<192x32xf32>, vector<16x192xf32> -> vector<16x192xf32>
    %3 = vector.extract_strided_slice %2 {offsets = [0, 0], sizes = [8, 192], strides = [1, 1]} : vector<16x192xf32> to vector<8x192xf32>
    %4 = vector.extract_strided_slice %3 {offsets = [0, 0], sizes = [8, 32], strides = [1, 1]} : vector<8x192xf32> to vector<8x32xf32>
    %5 = vector.extract_strided_slice %3 {offsets = [0, 32], sizes = [8, 32], strides = [1, 1]} : vector<8x192xf32> to vector<8x32xf32>
    %6 = vector.extract_strided_slice %3 {offsets = [0, 64], sizes = [8, 32], strides = [1, 1]} : vector<8x192xf32> to vector<8x32xf32>
    %cst_3 = arith.constant dense<0.000000e+00> : vector<8x8xf32>
    %7 = tpu.matmul %4, %5, %cst_3 {dimension_numbers = #tpu.dot_dimension_numbers<[1], [1], [0], [0], [0, 0, 1, 0], [], []>} : vector<8x32xf32>, vector<8x32xf32>, vector<8x8xf32> -> vector<8x8xf32>
    %cst_4 = arith.constant 0.176776692 : f32
    %8 = vector.broadcast %cst_4 : f32 to vector<8x8xf32>
    %9 = arith.mulf %7, %8 : vector<8x8xf32>
    %cst_5 = arith.constant dense<0xFF800000> : vector<8xf32>
    %10 = vector.multi_reduction <maximumf>, %9, %cst_5 [1] : vector<8x8xf32> to vector<8xf32>
    %11 = vector.shape_cast %10 : vector<8xf32> to vector<8x1xf32>
    %12 = vector.broadcast %11 : vector<8x1xf32> to vector<8x8xf32>
    %13 = arith.subf %9, %12 : vector<8x8xf32>
    %14 = math.exp %13 : vector<8x8xf32>
    %cst_6 = arith.constant dense<0.000000e+00> : vector<8xf32>
    %15 = vector.multi_reduction <add>, %14, %cst_6 [1] : vector<8x8xf32> to vector<8xf32>
    %16 = vector.shape_cast %15 : vector<8xf32> to vector<8x1xf32>
    %17 = vector.broadcast %16 : vector<8x1xf32> to vector<8x8xf32>
    %18 = arith.divf %14, %17 : vector<8x8xf32>
    %cst_7 = arith.constant dense<0.000000e+00> : vector<8x32xf32>
    %19 = tpu.matmul %18, %6, %cst_7 {dimension_numbers = #tpu.dot_dimension_numbers<[1], [0], [0], [1], [0, 0, 1, 1], [], []>} : vector<8x8xf32>, vector<8x32xf32>, vector<8x32xf32> -> vector<8x32xf32>
    %20 = vector.extract_strided_slice %3 {offsets = [0, 96], sizes = [8, 32], strides = [1, 1]} : vector<8x192xf32> to vector<8x32xf32>
    %21 = vector.extract_strided_slice %3 {offsets = [0, 128], sizes = [8, 32], strides = [1, 1]} : vector<8x192xf32> to vector<8x32xf32>
    %22 = vector.extract_strided_slice %3 {offsets = [0, 160], sizes = [8, 32], strides = [1, 1]} : vector<8x192xf32> to vector<8x32xf32>
    %cst_8 = arith.constant dense<0.000000e+00> : vector<8x8xf32>
    %23 = tpu.matmul %20, %21, %cst_8 {dimension_numbers = #tpu.dot_dimension_numbers<[1], [1], [0], [0], [0, 0, 1, 0], [], []>} : vector<8x32xf32>, vector<8x32xf32>, vector<8x8xf32> -> vector<8x8xf32>
    %cst_9 = arith.constant 0.176776692 : f32
    %24 = vector.broadcast %cst_9 : f32 to vector<8x8xf32>
    %25 = arith.mulf %23, %24 : vector<8x8xf32>
    %cst_10 = arith.constant dense<0xFF800000> : vector<8xf32>
    %26 = vector.multi_reduction <maximumf>, %25, %cst_10 [1] : vector<8x8xf32> to vector<8xf32>
    %27 = vector.shape_cast %26 : vector<8xf32> to vector<8x1xf32>
    %28 = vector.broadcast %27 : vector<8x1xf32> to vector<8x8xf32>
    %29 = arith.subf %25, %28 : vector<8x8xf32>
    %30 = math.exp %29 : vector<8x8xf32>
    %cst_11 = arith.constant dense<0.000000e+00> : vector<8xf32>
    %31 = vector.multi_reduction <add>, %30, %cst_11 [1] : vector<8x8xf32> to vector<8xf32>
    %32 = vector.shape_cast %31 : vector<8xf32> to vector<8x1xf32>
    %33 = vector.broadcast %32 : vector<8x1xf32> to vector<8x8xf32>
    %34 = arith.divf %30, %33 : vector<8x8xf32>
    %cst_12 = arith.constant dense<0.000000e+00> : vector<8x32xf32>
    %35 = tpu.matmul %34, %22, %cst_12 {dimension_numbers = #tpu.dot_dimension_numbers<[1], [0], [0], [1], [0, 0, 1, 1], [], []>} : vector<8x8xf32>, vector<8x32xf32>, vector<8x32xf32> -> vector<8x32xf32>
    %cst_13 = arith.constant 3.000000e-01 : f32
    %36 = vector.broadcast %cst_13 : f32 to vector<8x32xf32>
    %37 = arith.mulf %19, %36 : vector<8x32xf32>
    %cst_14 = arith.constant 0.699999988 : f32
    %38 = vector.broadcast %cst_14 : f32 to vector<8x32xf32>
    %39 = arith.mulf %35, %38 : vector<8x32xf32>
    %40 = arith.addf %37, %39 : vector<8x32xf32>
    %41 = vector.extract_strided_slice %2 {offsets = [8, 0], sizes = [8, 192], strides = [1, 1]} : vector<16x192xf32> to vector<8x192xf32>
    %42 = vector.extract_strided_slice %41 {offsets = [0, 0], sizes = [8, 32], strides = [1, 1]} : vector<8x192xf32> to vector<8x32xf32>
    %43 = vector.extract_strided_slice %41 {offsets = [0, 32], sizes = [8, 32], strides = [1, 1]} : vector<8x192xf32> to vector<8x32xf32>
    %44 = vector.extract_strided_slice %41 {offsets = [0, 64], sizes = [8, 32], strides = [1, 1]} : vector<8x192xf32> to vector<8x32xf32>
    %cst_15 = arith.constant dense<0.000000e+00> : vector<8x8xf32>
    %45 = tpu.matmul %42, %43, %cst_15 {dimension_numbers = #tpu.dot_dimension_numbers<[1], [1], [0], [0], [0, 0, 1, 0], [], []>} : vector<8x32xf32>, vector<8x32xf32>, vector<8x8xf32> -> vector<8x8xf32>
    %cst_16 = arith.constant 0.176776692 : f32
    %46 = vector.broadcast %cst_16 : f32 to vector<8x8xf32>
    %47 = arith.mulf %45, %46 : vector<8x8xf32>
    %cst_17 = arith.constant dense<0xFF800000> : vector<8xf32>
    %48 = vector.multi_reduction <maximumf>, %47, %cst_17 [1] : vector<8x8xf32> to vector<8xf32>
    %49 = vector.shape_cast %48 : vector<8xf32> to vector<8x1xf32>
    %50 = vector.broadcast %49 : vector<8x1xf32> to vector<8x8xf32>
    %51 = arith.subf %47, %50 : vector<8x8xf32>
    %52 = math.exp %51 : vector<8x8xf32>
    %cst_18 = arith.constant dense<0.000000e+00> : vector<8xf32>
    %53 = vector.multi_reduction <add>, %52, %cst_18 [1] : vector<8x8xf32> to vector<8xf32>
    %54 = vector.shape_cast %53 : vector<8xf32> to vector<8x1xf32>
    %55 = vector.broadcast %54 : vector<8x1xf32> to vector<8x8xf32>
    %56 = arith.divf %52, %55 : vector<8x8xf32>
    %cst_19 = arith.constant dense<0.000000e+00> : vector<8x32xf32>
    %57 = tpu.matmul %56, %44, %cst_19 {dimension_numbers = #tpu.dot_dimension_numbers<[1], [0], [0], [1], [0, 0, 1, 1], [], []>} : vector<8x8xf32>, vector<8x32xf32>, vector<8x32xf32> -> vector<8x32xf32>
    %58 = vector.extract_strided_slice %41 {offsets = [0, 96], sizes = [8, 32], strides = [1, 1]} : vector<8x192xf32> to vector<8x32xf32>
    %59 = vector.extract_strided_slice %41 {offsets = [0, 128], sizes = [8, 32], strides = [1, 1]} : vector<8x192xf32> to vector<8x32xf32>
    %60 = vector.extract_strided_slice %41 {offsets = [0, 160], sizes = [8, 32], strides = [1, 1]} : vector<8x192xf32> to vector<8x32xf32>
    %cst_20 = arith.constant dense<0.000000e+00> : vector<8x8xf32>
    %61 = tpu.matmul %58, %59, %cst_20 {dimension_numbers = #tpu.dot_dimension_numbers<[1], [1], [0], [0], [0, 0, 1, 0], [], []>} : vector<8x32xf32>, vector<8x32xf32>, vector<8x8xf32> -> vector<8x8xf32>
    %cst_21 = arith.constant 0.176776692 : f32
    %62 = vector.broadcast %cst_21 : f32 to vector<8x8xf32>
    %63 = arith.mulf %61, %62 : vector<8x8xf32>
    %cst_22 = arith.constant dense<0xFF800000> : vector<8xf32>
    %64 = vector.multi_reduction <maximumf>, %63, %cst_22 [1] : vector<8x8xf32> to vector<8xf32>
    %65 = vector.shape_cast %64 : vector<8xf32> to vector<8x1xf32>
    %66 = vector.broadcast %65 : vector<8x1xf32> to vector<8x8xf32>
    %67 = arith.subf %63, %66 : vector<8x8xf32>
    %68 = math.exp %67 : vector<8x8xf32>
    %cst_23 = arith.constant dense<0.000000e+00> : vector<8xf32>
    %69 = vector.multi_reduction <add>, %68, %cst_23 [1] : vector<8x8xf32> to vector<8xf32>
    %70 = vector.shape_cast %69 : vector<8xf32> to vector<8x1xf32>
    %71 = vector.broadcast %70 : vector<8x1xf32> to vector<8x8xf32>
    %72 = arith.divf %68, %71 : vector<8x8xf32>
    %cst_24 = arith.constant dense<0.000000e+00> : vector<8x32xf32>
    %73 = tpu.matmul %72, %60, %cst_24 {dimension_numbers = #tpu.dot_dimension_numbers<[1], [0], [0], [1], [0, 0, 1, 1], [], []>} : vector<8x8xf32>, vector<8x32xf32>, vector<8x32xf32> -> vector<8x32xf32>
    %cst_25 = arith.constant 3.000000e-01 : f32
    %74 = vector.broadcast %cst_25 : f32 to vector<8x32xf32>
    %75 = arith.mulf %57, %74 : vector<8x32xf32>
    %cst_26 = arith.constant 0.699999988 : f32
    %76 = vector.broadcast %cst_26 : f32 to vector<8x32xf32>
    %77 = arith.mulf %73, %76 : vector<8x32xf32>
    %78 = arith.addf %75, %77 : vector<8x32xf32>
    %79 = tpu.concatenate %40, %78 in 0 : vector<8x32xf32>, vector<8x32xf32> -> vector<16x32xf32>
    %c0_27 = arith.constant 0 : index
    %c0_28 = arith.constant 0 : index
    %80 = vector.load %arg3[%c0_27, %c0_28] : memref<128x32xf32, #tpu.memory_space<vmem>>, vector<128x32xf32>
    %cst_29 = arith.constant dense<0.000000e+00> : vector<16x128xf32>
    %81 = tpu.matmul %79, %80, %cst_29 {dimension_numbers = #tpu.dot_dimension_numbers<[1], [1], [0], [0], [0, 0, 1, 0], [], []>} : vector<16x32xf32>, vector<128x32xf32>, vector<16x128xf32> -> vector<16x128xf32>
    %c0_30 = arith.constant 0 : index
    %c0_31 = arith.constant 0 : index
    %82 = vector.load %arg4[%c0_30, %c0_31] : memref<1x128xf32, #tpu.memory_space<vmem>>, vector<1x128xf32>
    %83 = vector.broadcast %82 : vector<1x128xf32> to vector<16x128xf32>
    %84 = arith.addf %81, %83 : vector<16x128xf32>
    %c0_32 = arith.constant 0 : index
    %c0_33 = arith.constant 0 : index
    %85 = vector.load %arg5[%c0_32, %c0_33] : memref<16x128xf32, #tpu.memory_space<vmem>>, vector<16x128xf32>
    tpu.vector_store %arg5[%c0_32, %c0_33], %84 {strides = array<i32>} : memref<16x128xf32, #tpu.memory_space<vmem>>, vector<16x128xf32>,
    return
  }
  func.func @transform_0(%arg0: i32) -> (i32, i32) {
    %c0_i32 = arith.constant 0 : i32
    %c0_i32_0 = arith.constant 0 : i32
    %c0_i32_1 = arith.constant 0 : i32
    return %c0_i32, %c0_i32_0 : i32, i32
  }
  func.func @transform_1(%arg0: i32) -> (i32, i32) {
    %c0_i32 = arith.constant 0 : i32
    %c0_i32_0 = arith.constant 0 : i32
    %c0_i32_1 = arith.constant 0 : i32
    return %c0_i32, %c0_i32_0 : i32, i32
  }
  func.func @transform_2(%arg0: i32) -> (i32, i32) {
    %c0_i32 = arith.constant 0 : i32
    %c0_i32_0 = arith.constant 0 : i32
    %c0_i32_1 = arith.constant 0 : i32
    return %c0_i32, %c0_i32_0 : i32, i32
  }
  func.func @transform_3(%arg0: i32) -> (i32, i32) {
    %c0_i32 = arith.constant 0 : i32
    %c0_i32_0 = arith.constant 0 : i32
    %c0_i32_1 = arith.constant 0 : i32
    return %c0_i32, %c0_i32_0 : i32, i32
  }
  func.func @transform_4(%arg0: i32) -> (i32, i32) {
    %c0_i32 = arith.constant 0 : i32
    %c0_i32_0 = arith.constant 0 : i32
    %c0_i32_1 = arith.constant 0 : i32
    return %c0_i32, %c0_i32_0 : i32, i32
  }
}

</mosaic_0001>

<bundles_post_ra>
// kernel: tpu_custom_call.1
= control target key start
LH: loop header
LB: loop body
LE: loop exit
PB: predicated region body
PF: predicated region fallthrough
CT: control target
= control target key end

     0   :  { %vm44_vm0 = vcmask 261120   ;;  %s966_s0 = inlined_call_operand.vmem [shape: f32[16,32], index: 0, kind: input, shape index: {}]   ;;  %s967_s1 = inlined_call_operand.vmem [shape: f32[192,32], index: 1, kind: input, shape index: {}]   ;;  %s968_s2 = inlined_call_operand.vmem [shape: f32[128,32], index: 2, kind: input, shape index: {}]   ;;  %s969_s3 = inlined_call_operand.vmem [shape: f32[1,128], index: 3, kind: input, shape index: {}]   ;;  %s970_s4 = inlined_call_operand.hbm [shape: f32[16,128], index: 4, kind: output, shape index: {}]  }
   0x1   :  { %v35_v0 = vld [vmem:[%s967_s1 + $0x78] sm:$0xff]  ;;  %v34_v1 = vld [vmem:[%s967_s1 + $0x70] sm:$0xff] }
   0x2   :  { %605 = vmatpush.xpose.msk.msra.mxu0 %vm44_vm0, %v35_v0 }
   0x3   :  { %9 = vsyncpa [#allocation3], 0  ;;  %v33_v2 = vld [vmem:[%s967_s1 + $0x68] sm:$0xff]  ;;  %v32_v3 = vld [vmem:[%s967_s1 + $0x60] sm:$0xff]  ;;  %s712_s23 = smov 32   ;;  %s713_s24 = smov 96  }
   0x4   :  { %v31_v4 = vld [vmem:[%s967_s1 + $0x58] sm:$0xff]  ;;  %v30_v5 = vld [vmem:[%s967_s1 + $0x50] sm:$0xff]  ;;  %v29_v6 = vld [vmem:[%s967_s1 + $0x48] sm:$0xff]  ;;  %vm197_vm1 = vcmask 64512   ;;  %s593_s25 = sshll.u32 %s970_s4, 4  ;;  %s716_s26 = smov 128   ;;  %s594_s25 = int_to_ptr.hbm [resolvable:$true] %s593_s25 }
   0x5   :  { %v28_v7 = vld [vmem:[%s967_s1 + $0x40] sm:$0xff]  ;;  %v27_v8 = vld [vmem:[%s967_s1 + $0x38] sm:$0xff]  ;;  %v26_v9 = vld [vmem:[%s967_s1 + $0x30] sm:$0xff]  ;;  %s717_s27 = smov 8  }
   0x6   :  { %606 = vmatpush.xpose.msk.msra.mxu0 %vm44_vm0, %v34_v1  ;;  %v25_v10 = vld [vmem:[%s967_s1 + $0x28] sm:$0xff]  ;;  %v24_v11 = vld [vmem:[%s967_s1 + $0x20] sm:$0xff]  ;;  %v23_v12 = vld [vmem:[%s967_s1 + $0x18] sm:$0xff] }
   0x7   :  { %v22_v13 = vld [vmem:[%s967_s1 + $0x10] sm:$0xff]  ;;  %v21_v14 = vld [vmem:[%s967_s1 + $0x8] sm:$0xff]  ;;  %v20_v15 = vld [vmem:[%s967_s1] sm:$0xff] }
   0x8   :  { %v18_v16 = vld [vmem:[%s966_s0] sm:$0xff]  ;;  %v43_v22 = vld [vmem:[%s967_s1 + $0xb8] sm:$0xff]  ;;  %v42_v23 = vld [vmem:[%s967_s1 + $0xb0] sm:$0xff] }
   0x9   :  { %623 = vmatpush.xpose.msk.msra.mxu1 %vm44_vm0, %v43_v22  ;;  %v41_v24 = vld [vmem:[%s967_s1 + $0xa8] sm:$0xff]  ;;  %v40_v25 = vld [vmem:[%s967_s1 + $0xa0] sm:$0xff]  ;;  %v39_v26 = vld [vmem:[%s967_s1 + $0x98] sm:$0xff] }
   0xa   :  { %607 = vmatpush.xpose.msk.msra.mxu0 %vm44_vm0, %v33_v2  ;;  %v38_v27 = vld [vmem:[%s967_s1 + $0x90] sm:$0xff]  ;;  %v37_v28 = vld [vmem:[%s967_s1 + $0x88] sm:$0xff]  ;;  %v36_v29 = vld [vmem:[%s967_s1 + $0x80] sm:$0xff]  ;;  %s714_s1 = smov 64  }
   0xb   :  { %v19_v33 = vld [vmem:[%s966_s0 + $0x8] sm:$0xff] }
   0xd   :  { %624 = vmatpush.xpose.msk.msra.mxu1 %vm44_vm0, %v42_v23  ;;  %v501_v23 = vld [vmem:[%s968_s2 + $0x68] sm:$0xff] }
   0xe   :  { %608 = vmatpush.xpose.msk.msra.mxu0 %vm44_vm0, %v32_v3 }
  0x11   :  { %625 = vmatpush.xpose.msk.msra.mxu1 %vm44_vm0, %v41_v24  ;;  %v500_v24 = vld [vmem:[%s968_s2 + $0x60] sm:$0xff] }
  0x12   :  { %609 = vmatpush.xpose.msk.msra.mxu0 %vm44_vm0, %v31_v4 }
  0x15   :  { %626 = vmatpush.xpose.msk.msra.mxu1 %vm44_vm0, %v40_v25  ;;  %v499_v25 = vld [vmem:[%s968_s2 + $0x58] sm:$0xff] }
  0x16   :  { %610 = vmatpush.xpose.msk.msra.mxu0 %vm44_vm0, %v30_v5 }
  0x19   :  { %627 = vmatpush.xpose.msk.msra.mxu1 %vm44_vm0, %v39_v26  ;;  %v498_v26 = vld [vmem:[%s968_s2 + $0x50] sm:$0xff] }
  0x1a   :  { %611 = vmatpush.xpose.msk.msra.mxu0 %vm44_vm0, %v29_v6 }
  0x1d   :  { %628 = vmatpush.xpose.msk.msra.mxu1 %vm44_vm0, %v38_v27  ;;  %v497_v27 = vld [vmem:[%s968_s2 + $0x48] sm:$0xff] }
  0x1e   :  { %612 = vmatpush.xpose.msk.msra.mxu0 %vm44_vm0, %v28_v7 }
  0x21   :  { %629 = vmatpush.xpose.msk.msra.mxu1 %vm44_vm0, %v37_v28  ;;  %v496_v28 = vld [vmem:[%s968_s2 + $0x40] sm:$0xff] }
  0x22   :  { %613 = vmatpush.xpose.msk.msra.mxu0 %vm44_vm0, %v27_v8 }
  0x25   :  { %630 = vmatpush.xpose.msk.msra.mxu1 %vm44_vm0, %v36_v29  ;;  %v495_v29 = vld [vmem:[%s968_s2 + $0x38] sm:$0xff] }
  0x26   :  { %614 = vmatpush.xpose.msk.msra.mxu0 %vm44_vm0, %v26_v9 }
  0x28   :  { %631 = vmatmul.msk.f32.vlgmr.msra.gmra.mxu1 %vm44_vm0, %v18_v16 }
  0x2a   :  { %615 = vmatpush.xpose.msk.msra.mxu0 %vm44_vm0, %v25_v10 }
  0x2e   :  { %616 = vmatpush.xpose.msk.msra.mxu0 %vm44_vm0, %v24_v11 }
  0x30   :  { %632 = vmatmul.msk.f32.gmra.mxu1 %vm44_vm0, %v19_v33 }
  0x32   :  { %617 = vmatpush.xpose.msk.msra.mxu0 %vm44_vm0, %v23_v12 }
  0x36   :  { %618 = vmatpush.xpose.msk.msra.mxu0 %vm44_vm0, %v22_v13 }
  0x3a   :  { %619 = vmatpush.xpose.msk.msra.mxu0 %vm44_vm0, %v21_v14 }
  0x3e   :  { %620 = vmatpush.xpose.msk.msra.mxu0 %vm44_vm0, %v20_v15  ;;  %v503_v15 = vld [vmem:[%s968_s2 + $0x78] sm:$0xff] }
  0x3f   :  { %645 = vmatpush.xpose.msk.msra.mxu3 %vm44_vm0, %v503_v15 }
  0x41   :  { %621 = vmatmul.msk.f32.vlgmr.msra.gmra.mxu0 %vm44_vm0, %v18_v16 }
  0x49   :  { %622 = vmatmul.msk.f32.gmra.mxu0 %vm44_vm0, %v19_v33  ;;  %v491_v33 = vld [vmem:[%s968_s2 + $0x18] sm:$0xff] }
  0xa5   :  { %v163_v50 = vpop.f32.mrf.mxu1 }
  0xad   :  { %v865_v53 = vpop.f32.mrf.mxu1 }
  0xae   :  { %642 = vmatpush.xpose.msk.msrb.mxu1 %vm44_vm0, %v865_v53 }
  0xbe   :  { %v140_v17 = vpop.f32.mrf.mxu0 }
  0xbf   :  { %248 = vrot.lane.b32.xlu2 %v140_v17, %s712_s23  ;;  %170 = vrot.lane.b32.xlu0 %v140_v17, %s713_s24 }
  0xc6   :  { %v856_v37 = vpop.f32.mrf.mxu0 }
 0x119   :  { %v249_v51 = vpop.permute.xlu2 %248 }
 0x131   :  { %v171_v18 = vpop.permute.xlu0 %170 }
 0x132   :  { %633 = vmatpush.xpose.msk.msra.mxu2 %vm44_vm0, %v171_v18  ;;  %v502_v18 = vld [vmem:[%s968_s2 + $0x70] sm:$0xff] }
 0x133   :  { %646 = vmatpush.xpose.msk.msra.mxu3 %vm44_vm0, %v502_v18 }
 0x135   :  { %634 = vmatmul.msk.f32.vlgmr.msra.gmra.mxu2 %vm44_vm0, %v140_v17 }
 0x137   :  { %647 = vmatpush.xpose.msk.msra.mxu3 %vm44_vm0, %v501_v23 }
 0x13b   :  { %648 = vmatpush.xpose.msk.msra.mxu3 %vm44_vm0, %v500_v24 }
 0x13f   :  { %649 = vmatpush.xpose.msk.msra.mxu3 %vm44_vm0, %v499_v25 }
 0x143   :  { %650 = vmatpush.xpose.msk.msra.mxu3 %vm44_vm0, %v498_v26 }
 0x147   :  { %651 = vmatpush.xpose.msk.msra.mxu3 %vm44_vm0, %v497_v27 }
 0x14b   :  { %652 = vmatpush.xpose.msk.msra.mxu3 %vm44_vm0, %v496_v28 }
 0x14f   :  { %653 = vmatpush.xpose.msk.msra.mxu3 %vm44_vm0, %v495_v29 }
 0x1b8   :  { %v193_v19 = vpop.f32.mrf.mxu2 }
 0x1b9   :  { %v196_v20 = vmul.f32 0.17677669, %v193_v19 }
 0x1bb   :  { %v198_v21 = vsel %vm197_vm1, %v196_v20, -inf }
 0x1bc   :  { %199 = vmax.xlane.f32.xlu0 %v198_v21 }
 0x1d0   :  { %330 = vrot.lane.b32.xlu0 %v856_v37, %s713_s24 }
 0x1d8   :  { %407 = vrot.lane.b32.xlu0 %v856_v37, %s712_s23 }
 0x22f   :  { %v200_v30 = vpop.xlane.xlu0 %199 }
 0x230   :  { %v201_v31 = vsub.f32 %v196_v20, %v200_v30  ;;  %v494_v30 = vld [vmem:[%s968_s2 + $0x30] sm:$0xff] }
 0x231   :  { %654 = vmatpush.xpose.msk.msra.mxu3 %vm44_vm0, %v494_v30 }
 0x232   :  { %v202_v32 = vmul.f32 1.442695, %v201_v31  ;;  %v493_v31 = vld [vmem:[%s968_s2 + $0x28] sm:$0xff] }
 0x234   :  { %670 = vpow2.f32 %v202_v32  ;;  %v492_v32 = vld [vmem:[%s968_s2 + $0x20] sm:$0xff] }
 0x235   :  { %655 = vmatpush.xpose.msk.msra.mxu3 %vm44_vm0, %v493_v31 }
 0x239   :  { %656 = vmatpush.xpose.msk.msra.mxu3 %vm44_vm0, %v492_v32 }
 0x23a   :  { %v671_v34 = vpop.eup %670 }
 0x23b   :  { %v204_v35 = vsel %vm197_vm1, %v671_v34, 0.0 }
 0x23c   :  { %205 = vadd.xlane.f32.xlu1 %v204_v35  ;;  %v489_v35 = vld [vmem:[%s968_s2 + $0x8] sm:$0xff] }
 0x23d   :  { %657 = vmatpush.xpose.msk.msra.mxu3 %vm44_vm0, %v491_v33 }
 0x242   :  { %v331_v52 = vpop.permute.xlu0 %330 }
 0x24a   :  { %v408_v54 = vpop.permute.xlu0 %407 }
 0x24b   :  { %643 = vmatmul.msk.f32.vlgmr.msrb.gmra.mxu1 %vm44_vm0, %v408_v54 }
 0x255   :  { %222 = vrot.lane.b32.xlu1 %v140_v17, %s714_s1 }
 0x2af   :  { %v206_v36 = vpop.xlane.xlu1 %205 }
 0x2b0   :  { %672 = vrcp.f32 %v206_v36  ;;  %v218_v43 = vand.u32 2147483648, %v206_v36  ;;  %vm212_vm3 = vweird.f32 %v206_v36  ;;  %v216_v44 = vand.u32 2147483647, %v206_v36 }
 0x2b2   :  { %v219_v46 = vor.u32 1.1754944e-38, %v218_v43  ;;  %vm217_vm5 = vcmp.eq.f32.partialorder %v216_v44, 8.507059e+37 }
 0x2b6   :  { %v673_v38 = vpop.eup %672 }
 0x2b7   :  { %v208_v39 = vmul.f32 %v673_v38, %v206_v36  ;;  %vm213_vm2 = vweird.f32 %v673_v38  ;;  %v488_v36 = vld [vmem:[%s968_s2] sm:$0xff] }
 0x2b8   :  { %vm214_vm4 = vmor %vm212_vm3, %vm213_vm2 }
 0x2b9   :  { %v209_v40 = vsub.f32 1.0, %v208_v39 }
 0x2bb   :  { %v210_v41 = vmul.f32 %v673_v38, %v209_v40 }
 0x2bd   :  { %v211_v42 = vadd.f32 %v673_v38, %v210_v41 }
 0x2bf   :  { %v215_v45 = vsel %vm214_vm4, %v673_v38, %v211_v42 }
 0x2c0   :  { %v220_v47 = vsel %vm217_vm5, %v219_v46, %v215_v45 }
 0x2c1   :  { %v221_v49 = vmul.f32 %v671_v34, %v220_v47  ;;  %v490_v34 = vld [vmem:[%s968_s2 + $0x10] sm:$0xff] }
 0x2c2   :  { %658 = vmatpush.xpose.msk.msra.mxu3 %vm44_vm0, %v490_v34 }
 0x2c6   :  { %659 = vmatpush.xpose.msk.msra.mxu3 %vm44_vm0, %v489_v35 }
 0x2c7   :  { %v223_v48 = vpop.permute.xlu1 %222 }
 0x2c8   :  { %243 = vmatpush.msrb.mxu2 %v223_v48  ;;  %v431_v0 = vpop.f32.mrf.mxu1 }
 0x2c9   :  { %635 = vmatmul.msk.f32.vlgmr.msrb.gmra.mxu2 %vm197_vm1, %v221_v49  ;;  %v434_v2 = vmul.f32 0.17677669, %v431_v0  ;;  %v669_v49 = vld [vmem:[%s969_s3] ss:$0 sm:$0xff]  ;;  %s715_s3 = smov [#allocation2]  }
 0x2ca   :  { %636 = vmatpush.xpose.msk.msra.mxu2 %vm44_vm0, %v163_v50  ;;  %660 = vmatpush.xpose.msk.msra.mxu3 %vm44_vm0, %v488_v36 }
 0x2cb   :  { %v435_v3 = vsel %vm197_vm1, %v434_v2, -inf }
 0x2d1   :  { %637 = vmatmul.msk.f32.vlgmr.msra.gmra.mxu2 %vm44_vm0, %v249_v51 }
 0x34c   :  { %v870_v55 = vpop.f32.mrf.mxu2 }
 0x34d   :  { %v326_v38 = vmul.f32 0.3, %v870_v55 }
 0x354   :  { %v272_v56 = vpop.f32.mrf.mxu2 }
 0x355   :  { %v275_v57 = vmul.f32 0.17677669, %v272_v56 }
 0x357   :  { %v276_v58 = vsel %vm197_vm1, %v275_v57, -inf }
 0x358   :  { %277 = vmax.xlane.f32.xlu2 %v276_v58 }
 0x370   :  { %300 = vrot.lane.b32.xlu2 %v163_v50, %s713_s24 }
 0x3cb   :  { %v278_v59 = vpop.xlane.xlu2 %277 }
 0x3cc   :  { %v279_v60 = vsub.f32 %v275_v57, %v278_v59 }
 0x3ce   :  { %v280_v61 = vmul.f32 1.442695, %v279_v60 }
 0x3d0   :  { %674 = vpow2.f32 %v280_v61 }
 0x3d3   :  { %v301_v62 = vpop.permute.xlu2 %300 }
 0x3d4   :  { %321 = vmatpush.msrb.mxu2 %v301_v62 }
 0x3d6   :  { %639 = vmatpush.xpose.msk.msra.mxu2 %vm44_vm0, %v331_v52  ;;  %v675_v63 = vpop.eup %674 }
 0x3d7   :  { %v282_v1 = vsel %vm197_vm1, %v675_v63, 0.0 }
 0x3d8   :  { %283 = vadd.xlane.f32.xlu1 %v282_v1 }
 0x3e0   :  { %436 = vmax.xlane.f32.xlu1 %v435_v3 }
 0x44b   :  { %v284_v4 = vpop.xlane.xlu1 %283 }
 0x44c   :  { %676 = vrcp.f32 %v284_v4  ;;  %v296_v10 = vand.u32 2147483648, %v284_v4  ;;  %v294_v13 = vand.u32 2147483647, %v284_v4  ;;  %vm290_vm7 = vweird.f32 %v284_v4 }
 0x44e   :  { %v297_v16 = vor.u32 1.1754944e-38, %v296_v10  ;;  %vm295_vm9 = vcmp.eq.f32.partialorder %v294_v13, 8.507059e+37 }
 0x452   :  { %v677_v5 = vpop.eup %676 }
 0x453   :  { %v286_v6 = vmul.f32 %v677_v5, %v284_v4  ;;  %v437_v7 = vpop.xlane.xlu1 %436  ;;  %vm291_vm6 = vweird.f32 %v677_v5 }
 0x454   :  { %v438_v8 = vsub.f32 %v434_v2, %v437_v7  ;;  %vm292_vm8 = vmor %vm290_vm7, %vm291_vm6 }
 0x455   :  { %v287_v9 = vsub.f32 1.0, %v286_v6 }
 0x456   :  { %v439_v11 = vmul.f32 1.442695, %v438_v8 }
 0x457   :  { %v288_v12 = vmul.f32 %v677_v5, %v287_v9 }
 0x458   :  { %678 = vpow2.f32 %v439_v11 }
 0x459   :  { %v289_v14 = vadd.f32 %v677_v5, %v288_v12 }
 0x45b   :  { %v293_v17 = vsel %vm292_vm8, %v677_v5, %v289_v14 }
 0x45c   :  { %v298_v19 = vsel %vm295_vm9, %v297_v16, %v293_v17 }
 0x45d   :  { %v299_v20 = vmul.f32 %v675_v63, %v298_v19 }
 0x45e   :  { %v884_v21 = vpop.eup %678 }
 0x45f   :  { %638 = vmatmul.msk.f32.vlgmr.msrb.gmra.mxu2 %vm197_vm1, %v299_v20  ;;  %v441_v22 = vsel %vm197_vm1, %v884_v21, 0.0 }
 0x460   :  { %442 = vadd.xlane.f32.xlu1 %v441_v22 }
 0x467   :  { %640 = vmatmul.msk.f32.vlgmr.msra.gmra.mxu2 %vm44_vm0, %v856_v37 }
 0x479   :  { %381 = vrot.lane.b32.xlu1 %v856_v37, %s714_s1 }
 0x4d3   :  { %v443_v39 = vpop.xlane.xlu1 %442 }
 0x4d4   :  { %vm449_vm11 = vweird.f32 %v443_v39  ;;  %v455_v3 = vand.u32 2147483648, %v443_v39  ;;  %v453_v6 = vand.u32 2147483647, %v443_v39 }
 0x4d6   :  { %v456_v10 = vor.u32 1.1754944e-38, %v455_v3  ;;  %vm454_vm3 = vcmp.eq.f32.partialorder %v453_v6, 8.507059e+37 }
 0x4e2   :  { %v323_v37 = vpop.f32.mrf.mxu2 }
 0x4e3   :  { %v327_v40 = vmul.f32 0.7, %v323_v37 }
 0x4e5   :  { %v328_v41 = vadd.f32 %v327_v40, %v326_v38 }
 0x4e7   :  { %661 = vmatmul.msk.f32.vlgmr.msra.gmra.mxu3 %vm44_vm0, %v328_v41 }
 0x4ea   :  { %v353_v42 = vpop.f32.mrf.mxu2 }
 0x4eb   :  { %v356_v43 = vmul.f32 0.17677669, %v353_v42  ;;  %v382_v44 = vpop.permute.xlu1 %381 }
 0x4ec   :  { %402 = vmatpush.msrb.mxu2 %v382_v44 }
 0x4ed   :  { %v357_v45 = vsel %vm197_vm1, %v356_v43, -inf }
 0x4ee   :  { %358 = vmax.xlane.f32.xlu2 %v357_v45 }
 0x506   :  { %459 = vrot.lane.b32.xlu2 %v865_v53, %s713_s24  ;;  %s591_s24 = sshll.u32 %s715_s3, 4  ;;  %s592_s24 = int_to_ptr.vmem [resolvable:$true] %s591_s24 }
 0x561   :  { %v359_v46 = vpop.xlane.xlu2 %358 }
 0x562   :  { %v360_v47 = vsub.f32 %v356_v43, %v359_v46 }
 0x564   :  { %v361_v48 = vmul.f32 1.442695, %v360_v47 }
 0x566   :  { %680 = vpow2.f32 %v361_v48 }
 0x567   :  { %682 = vrcp.f32 %v443_v39 }
 0x569   :  { %v460_v50 = vpop.permute.xlu2 %459 }
 0x56a   :  { %480 = vmatpush.msra.mxu2 %v460_v50  ;;  %v579_v51 = vpop.f32.mrf.mxu3 }
 0x56b   :  { %v580_v52 = vadd.f32 %v669_v49, %v579_v51 }
 0x56c   :  { %v681_v54 = vpop.eup %680 }
 0x56d   :  { %585 = vst [vmem:[#allocation2] sm:$0xff] %v580_v52  ;;  %v363_v55 = vsel %vm197_vm1, %v681_v54, 0.0  ;;  %v683_v53 = vpop.eup %682 }
 0x56e   :  { %364 = vadd.xlane.f32.xlu0 %v363_v55  ;;  %v445_v57 = vmul.f32 %v683_v53, %v443_v39  ;;  %vm450_vm12 = vweird.f32 %v683_v53 }
 0x56f   :  { %vm451_vm2 = vmor %vm449_vm11, %vm450_vm12 }
 0x570   :  { %v446_v59 = vsub.f32 1.0, %v445_v57 }
 0x572   :  { %v447_v63 = vmul.f32 %v683_v53, %v446_v59 }
 0x574   :  { %v448_v5 = vadd.f32 %v683_v53, %v447_v63 }
 0x576   :  { %v452_v11 = vsel %vm451_vm2, %v683_v53, %v448_v5 }
 0x577   :  { %v457_v12 = vsel %vm454_vm3, %v456_v10, %v452_v11 }
 0x578   :  { %v458_v13 = vmul.f32 %v884_v21, %v457_v12 }
 0x5e1   :  { %v365_v56 = vpop.xlane.xlu0 %364 }
 0x5e2   :  { %684 = vrcp.f32 %v365_v56  ;;  %v377_v62 = vand.u32 2147483648, %v365_v56  ;;  %v375_v1 = vand.u32 2147483647, %v365_v56  ;;  %vm371_vm13 = vweird.f32 %v365_v56 }
 0x5e4   :  { %v378_v4 = vor.u32 1.1754944e-38, %v377_v62  ;;  %vm376_vm15 = vcmp.eq.f32.partialorder %v375_v1, 8.507059e+37 }
 0x5e8   :  { %v685_v58 = vpop.eup %684 }
 0x5e9   :  { %v367_v60 = vmul.f32 %v685_v58, %v365_v56  ;;  %vm372_vm10 = vweird.f32 %v685_v58 }
 0x5ea   :  { %vm373_vm14 = vmor %vm371_vm13, %vm372_vm10 }
 0x5eb   :  { %v368_v61 = vsub.f32 1.0, %v367_v60 }
 0x5ed   :  { %v369_v0 = vmul.f32 %v685_v58, %v368_v61 }
 0x5ef   :  { %v370_v2 = vadd.f32 %v685_v58, %v369_v0 }
 0x5f1   :  { %v374_v7 = vsel %vm373_vm14, %v685_v58, %v370_v2 }
 0x5f2   :  { %v379_v8 = vsel %vm376_vm15, %v378_v4, %v374_v7 }
 0x5f3   :  { %v380_v9 = vmul.f32 %v681_v54, %v379_v8 }
 0x5f5   :  { %641 = vmatmul.msk.f32.vlgmr.msrb.gmra.mxu2 %vm197_vm1, %v380_v9 }
 0x5fd   :  { %644 = vmatmul.msk.f32.vlgmr.msra.gmra.mxu2 %vm197_vm1, %v458_v13 }
 0x678   :  { %v404_v14 = vpop.f32.mrf.mxu2 }
 0x679   :  { %v485_v16 = vmul.f32 0.3, %v404_v14 }
 0x680   :  { %v482_v15 = vpop.f32.mrf.mxu2 }
 0x681   :  { %v486_v17 = vmul.f32 0.7, %v482_v15 }
 0x683   :  { %v487_v18 = vadd.f32 %v486_v17, %v485_v16 }
 0x685   :  { %662 = vmatmul.msk.f32.gmra.mxu3 %vm44_vm0, %v487_v18 }
 0x708   :  { %v582_v19 = vpop.f32.mrf.mxu3 }
 0x709   :  { %v583_v20 = vadd.f32 %v669_v49, %v582_v19 }
 0x70b   :  { %586 = vst [vmem:[#allocation2 + $0x8] sm:$0xff] %v583_v20 }
 0x70c   :  { %599 = dma.vmem_to_hbm [thread:$0]  %s592_s24, 256, %s594_s25, [#allocation3], %s716_s26, %s716_s26, %s717_s27  }
 0x70d   :  { %710 = dma.done.wait [#allocation3], 256  }
 0x70e   :  { %711 = vsyncadd [#allocation3], 4294967040 }
 0x70f   :  { %604 = vsyncpa [#allocation3], 1 }

</bundles_post_ra>
